<compile_context>
chip_gen: v5e
topology: v5e:2x2
jax: 0.10.0
libtpu: 0.0.40
codegen_flags: <defaults>
</compile_context>

<pallas_src>
import functools

import jax
import jax.numpy as jnp
from jax import lax
from jax.experimental import pallas as pl
from jax.experimental.pallas import tpu as pltpu

EPS = 1e-6


# --------------------------- per-generation budget ---------------------------

def _vmem_capacity_bytes():
    try:
        return int(pltpu.get_tpu_info().vmem_capacity_bytes)
    except Exception:
        return 64 * 1024 * 1024  # conservative (v7x-sized) when query unavailable


_VMEM_CAP = _vmem_capacity_bytes()
_SMALL_VMEM = _VMEM_CAP <= 64 * 1024 * 1024          # v7x-class part (64 MiB/TC)
_VMEM_LIMIT = min(int(_VMEM_CAP * 3 // 4), 100 * 1024 * 1024)
_ROW_TILE_TARGET = (2 << 20) if _SMALL_VMEM else (8 << 20)   # HBM tile target
_MIN_ROW_TILES = 2 if _SMALL_VMEM else 1             # keep both v7x TCs busy


# ----------------------------- tiling helpers -------------------------------

def _round_up(x, m):
    return (x + m - 1) // m * m


def _row_tile(n, max_rows, min_tiles=1):
    """Largest row tile that is a multiple of 8, divides n, is <= max_rows and
    leaves at least `min_tiles` grid steps.  Falls back to the full extent when
    n is not a multiple of 8 (a full-dim block is always legal)."""
    if n % 8 != 0:
        return n
    rb = max(8, (min(n, max_rows) // 8) * 8)
    if min_tiles > 1 and n >= 8 * min_tiles:
        rb = min(rb, max(8, ((n // min_tiles) // 8) * 8))
    while rb > 8 and n % rb != 0:
        rb -= 8
    return rb


def _divisor_tile(dim, pref, mult):
    """Largest tile <= pref that is a multiple of `mult` and divides `dim`;
    falls back to the full dim (always a legal block extent)."""
    if dim <= pref or dim % mult != 0:
        return dim
    t = (pref // mult) * mult
    while t >= mult and dim % t != 0:
        t -= mult
    return t if (t >= mult and dim % t == 0) else dim


def _maybe_lane_dense(n, d):
    """For pure elementwise kernels: present a lane-dense (R, 128) slab when d
    is not a multiple of 128 so stores are unmasked."""
    total = n * d
    if d % 128 != 0 and total % 128 == 0:
        return total // 128, 128, True
    return n, d, False


# ------------------------------ LayerNorm math -------------------------------

def _ln_rows_f32(x, d_valid):
    """torch-LayerNorm numerics on an f32 tile: unbiased std (d-1), eps added
    to the std.  `d_valid` is the true feature width; lanes >= d_valid hold
    zero padding and are masked out of the statistics."""
    d_pad = x.shape[-1]
    mean = jnp.sum(x, axis=-1, keepdims=True) * (1.0 / d_valid)
    diff = x - mean
    if d_valid != d_pad:
        lane = lax.broadcasted_iota(jnp.int32, x.shape, x.ndim - 1)
        diff = jnp.where(lane < d_valid, diff, 0.0)
    var = jnp.sum(diff * diff, axis=-1, keepdims=True) * (1.0 / max(d_valid - 1, 1))
    std = jnp.sqrt(var)
    # Exact divide (not approx reciprocal) to keep parity with the torch math.
    return diff * (1.0 / (std + EPS))


# ----------------------------- fused kernel ---------------------------------
# out = x + [keep_scale *]( LayerNorm(x) @ W + b )  -- one HBM read/write of x.

def _fused_kernel(x_ref, gamma_ref, beta_ref, w_ref, b_ref, *rest,
                  d_valid, has_scale):
    o_ref = rest[-1]
    scale_ref = rest[0] if has_scale else None
    x = x_ref[...].astype(jnp.float32)
    h = gamma_ref[...] * _ln_rows_f32(x, d_valid) + beta_ref[...]
    # bf16 MXU matmul with f32 accumulation (W was pre-cast once in the wrapper).
    y = jnp.dot(h.astype(jnp.bfloat16), w_ref[...],
                preferred_element_type=jnp.float32)
    y = y + b_ref[...]
    if has_scale:
        y = y * scale_ref[...]          # dropout: keep_mask / keep_prob (0 or 1/p)
    o_ref[...] = (x + y).astype(o_ref.dtype)


def fused_sublayer_connection(x2d, gamma, beta, w, b, *, keep_scale=None):
    """Fully fused LN -> matmul -> (dropout) -> residual.  Returns None when
    the weight cannot be held resident in VMEM (caller uses the tiled path)."""
    n, d = x2d.shape
    d_pad = max(_round_up(d, 128), 128)
    pad = d_pad - d

    # VMEM budget: resident bf16 W (single-buffered via Buffered(1)) + per-row
    # cost of double-buffered x/out (+scale) tiles and ~6 (rb, d) f32 temps.
    w_bytes = d_pad * d_pad * 2
    const_bytes = 4 * d_pad * 4
    avail = _VMEM_LIMIT - w_bytes - const_bytes
    per_row = d_pad * (4 * x2d.dtype.itemsize
                       + (2 * 4 if keep_scale is not None else 0)
                       + 6 * 4)
    max_rows = avail // per_row if avail > 0 else 0
    if max_rows < 8:
        return None

    w_bf = w.astype(jnp.bfloat16)
    if pad:
        # Zero-pad to a lane-dense 128 multiple.  LN masks the pad lanes and
        # the W/bias pads are zero, so padded output columns are exactly zero.
        x_in = jnp.pad(x2d, ((0, 0), (0, pad)))
        w_bf = jnp.pad(w_bf, ((0, pad), (0, pad)))
        gamma_in = jnp.pad(gamma.astype(jnp.float32), (0, pad)).reshape(1, d_pad)
        beta_in = jnp.pad(beta.astype(jnp.float32), (0, pad)).reshape(1, d_pad)
        b_in = jnp.pad(b.astype(jnp.float32), (0, pad)).reshape(1, d_pad)
        scale_in = (jnp.pad(keep_scale, ((0, 0), (0, pad)))
                    if keep_scale is not None else None)
    else:
        x_in = x2d
        gamma_in = gamma.reshape(1, d).astype(jnp.float32)
        beta_in = beta.reshape(1, d).astype(jnp.float32)
        b_in = b.reshape(1, d).astype(jnp.float32)
        scale_in = keep_scale

    target_rows = max(8, _ROW_TILE_TARGET // (d_pad * x2d.dtype.itemsize))
    rb = _row_tile(n, min(max_rows, target_rows), _MIN_ROW_TILES)

    const = functools.partial(pl.BlockSpec, index_map=lambda i: (0, 0),
                              pipeline_mode=pl.Buffered(1))
    in_specs = [
        pl.BlockSpec((rb, d_pad), lambda i: (i, 0)),
        const((1, d_pad)),            # gamma   (fetched once, single-buffered)
        const((1, d_pad)),            # beta
        const((d_pad, d_pad)),        # W (resident, bf16)
        const((1, d_pad)),            # bias
    ]
    args = [x_in, gamma_in, beta_in, w_bf, b_in]
    if scale_in is not None:
        in_specs.append(pl.BlockSpec((rb, d_pad), lambda i: (i, 0)))
        args.append(scale_in)

    kernel = functools.partial(_fused_kernel, d_valid=d,
                               has_scale=scale_in is not None)
    out = pl.pallas_call(
        kernel,
        out_shape=jax.ShapeDtypeStruct((n, d_pad), x2d.dtype),
        grid_spec=pltpu.PrefetchScalarGridSpec(
            num_scalar_prefetch=0,
            grid=(n // rb,),
            in_specs=in_specs,
            out_specs=pl.BlockSpec((rb, d_pad), lambda i: (i, 0)),
        ),
        compiler_params=pltpu.CompilerParams(
            dimension_semantics=("parallel",), vmem_limit_bytes=_VMEM_LIMIT),
    )(*args)
    return out[:, :d] if pad else out


# ------------------------ standalone LayerNorm kernel ------------------------

def _layernorm_kernel(x_ref, alpha_ref, bias_ref, o_ref, *, d_valid):
    x = x_ref[...].astype(jnp.float32)
    y = alpha_ref[...] * _ln_rows_f32(x, d_valid) + bias_ref[...]
    o_ref[...] = y.astype(o_ref.dtype)


def pallas_layernorm(x2d, alpha, bias):
    n, d = x2d.shape
    max_rows = max(8, _ROW_TILE_TARGET // max(1, d * x2d.dtype.itemsize))
    rb = _row_tile(n, max_rows, _MIN_ROW_TILES)
    kernel = functools.partial(_layernorm_kernel, d_valid=d)
    return pl.pallas_call(
        kernel,
        out_shape=jax.ShapeDtypeStruct((n, d), x2d.dtype),
        grid_spec=pltpu.PrefetchScalarGridSpec(
            num_scalar_prefetch=0,
            grid=(n // rb,),
            in_specs=[
                pl.BlockSpec((rb, d), lambda i: (i, 0)),
                pl.BlockSpec((1, d), lambda i: (0, 0),
                             pipeline_mode=pl.Buffered(1)),
                pl.BlockSpec((1, d), lambda i: (0, 0),
                             pipeline_mode=pl.Buffered(1)),
            ],
            out_specs=pl.BlockSpec((rb, d), lambda i: (i, 0)),
        ),
        compiler_params=pltpu.CompilerParams(
            dimension_semantics=("parallel",), vmem_limit_bytes=_VMEM_LIMIT),
    )(x2d, alpha.reshape(1, d).astype(jnp.float32),
      bias.reshape(1, d).astype(jnp.float32))


# --------------------------- elementwise residuals ---------------------------

def _residual_add_kernel(x_ref, y_ref, o_ref):
    o_ref[...] = (x_ref[...].astype(jnp.float32)
                  + y_ref[...].astype(jnp.float32)).astype(o_ref.dtype)


def _residual_scale_kernel(x_ref, y_ref, s_ref, o_ref):
    y = y_ref[...].astype(jnp.float32) * s_ref[...]
    o_ref[...] = (x_ref[...].astype(jnp.float32) + y).astype(o_ref.dtype)


def _elementwise_call(kernel, arrays, out_dtype):
    n, d = arrays[0].shape
    rn, rd, reshaped = _maybe_lane_dense(n, d)
    flat = [a.reshape(rn, rd) for a in arrays]
    max_rows = max(8, _ROW_TILE_TARGET // max(1, rd * arrays[0].dtype.itemsize))
    rb = _row_tile(rn, max_rows, _MIN_ROW_TILES)
    out = pl.pallas_call(
        kernel,
        out_shape=jax.ShapeDtypeStruct((rn, rd), out_dtype),
        grid_spec=pltpu.PrefetchScalarGridSpec(
            num_scalar_prefetch=0,
            grid=(rn // rb,),
            in_specs=[pl.BlockSpec((rb, rd), lambda i: (i, 0))
                      for _ in arrays],
            out_specs=pl.BlockSpec((rb, rd), lambda i: (i, 0)),
        ),
        compiler_params=pltpu.CompilerParams(
            dimension_semantics=("parallel",), vmem_limit_bytes=_VMEM_LIMIT),
    )(*flat)
    return out.reshape(n, d) if reshaped else out


def pallas_residual_add(x2d, y2d):
    return _elementwise_call(_residual_add_kernel, [x2d, y2d], x2d.dtype)


def pallas_residual_dropout(x2d, y2d, keep_scale):
    return _elementwise_call(_residual_scale_kernel, [x2d, y2d, keep_scale],
                             x2d.dtype)


# ---------------- tiled matmul with optional fused epilogue ------------------
# o = (x @ W + b) [* keep_scale] [+ residual]   (residual/dropout fused into
# the k == last epilogue -> no extra HBM round-trip of the (M, N) product).

def _linear_kernel(x_ref, w_ref, b_ref, *rest, has_residual, has_scale):
    idx = 0
    res_ref = None
    scale_ref = None
    if has_residual:
        res_ref = rest[idx]; idx += 1
    if has_scale:
        scale_ref = rest[idx]; idx += 1
    o_ref = rest[idx]
    acc_ref = rest[idx + 1]

    k = pl.program_id(2)

    @pl.when(k == 0)
    def _():
        acc_ref[...] = jnp.zeros_like(acc_ref)

    acc_ref[...] += jnp.dot(x_ref[...], w_ref[...],
                            preferred_element_type=jnp.float32)

    @pl.when(k == pl.num_programs(2) - 1)
    def _():
        y = acc_ref[...] + b_ref[...].astype(jnp.float32)
        if has_scale:
            y = y * scale_ref[...].astype(jnp.float32)
        if has_residual:
            y = y + res_ref[...].astype(jnp.float32)
        o_ref[...] = y.astype(o_ref.dtype)


def pallas_linear(x2d, w, b, *, residual=None, keep_scale=None, out_dtype=None):
    m, k = x2d.shape
    _, n = w.shape
    out_dtype = out_dtype or x2d.dtype
    x_bf = x2d.astype(jnp.bfloat16)        # bf16 MXU, f32 accumulation
    w_bf = w.astype(jnp.bfloat16)

    if _SMALL_VMEM:                         # v7x (64 MiB/TC)
        tm_pref, tn_pref, tk_pref = 256, 256, 512
    else:                                   # v5e / v6e (128 MiB)
        tm_pref, tn_pref, tk_pref = 512, 256, 1024
    tm = _divisor_tile(m, tm_pref, 8)
    tn = _divisor_tile(n, tn_pref, 128)
    tk = _divisor_tile(k, tk_pref, 128)

    in_specs = [
        pl.BlockSpec((tm, tk), lambda i, j, kk: (i, kk)),
        pl.BlockSpec((tk, tn), lambda i, j, kk: (kk, j)),
        pl.BlockSpec((1, tn), lambda i, j, kk: (0, j)),
    ]
    args = [x_bf, w_bf, b.reshape(1, n).astype(jnp.float32)]
    if residual is not None:
        in_specs.append(pl.BlockSpec((tm, tn), lambda i, j, kk: (i, j)))
        args.append(residual)
    if keep_scale is not None:
        in_specs.append(pl.BlockSpec((tm, tn), lambda i, j, kk: (i, j)))
        args.append(keep_scale)

    kernel = functools.partial(_linear_kernel,
                               has_residual=residual is not None,
                               has_scale=keep_scale is not None)
    return pl.pallas_call(
        kernel,
        out_shape=jax.ShapeDtypeStruct((m, n), out_dtype),
        grid_spec=pltpu.PrefetchScalarGridSpec(
            num_scalar_prefetch=0,
            grid=(m // tm, n // tn, k // tk),
            in_specs=in_specs,
            out_specs=pl.BlockSpec((tm, tn), lambda i, j, kk: (i, j)),
            scratch_shapes=[pltpu.VMEM((tm, tn), jnp.float32)],
        ),
        compiler_params=pltpu.CompilerParams(
            dimension_semantics=("parallel", "parallel", "arbitrary"),
            vmem_limit_bytes=_VMEM_LIMIT),
    )(*args)


# ----------------------------- module ---------------------------------------

class LinearSublayer:
    """Dense sublayer whose weights the fused kernel can consume directly."""

    def __init__(self, w, b):
        self.w = w
        self.b = b

    def __call__(self, h):
        bb, s, d = h.shape
        return pallas_linear(h.reshape(bb * s, d), self.w, self.b).reshape(
            bb, s, -1)


class SublayerConnection:
    """out = x + dropout(sublayer(LayerNorm(x)))."""

    def __init__(self, size, dropout):
        self.size = size
        self.dropout_rate = float(dropout)
        self.alpha = jnp.ones((size,), jnp.float32)   # LayerNorm scale
        self.bias = jnp.zeros((size,), jnp.float32)   # LayerNorm shift

    def __call__(self, x, sublayer, *, training=False, rng=None):
        b, s, d = x.shape
        n = b * s
        x2d = x.reshape(n, d)

        keep_scale = None
        if training and self.dropout_rate > 0.0:
            keep_prob = 1.0 - self.dropout_rate
            if keep_prob <= 0.0:
                return x                      # everything dropped -> pure residual
            rng = jax.random.PRNGKey(0) if rng is None else rng
            # TODO(synk): dropout mask is generated host-side with jax.random
            # (pltpu.prng_* has no CPU/interpret lowering); keep/1-p rescale
            # semantics match torch, the RNG stream does not.
            keep_scale = (jax.random.bernoulli(rng, keep_prob, (n, d))
                          .astype(jnp.float32) * (1.0 / keep_prob))

        # Fast path: linear sublayer with square weights -> single fused kernel
        # (LN + matmul + dropout + residual), one HBM read/write of x.
        if isinstance(sublayer, LinearSublayer) and sublayer.w.shape == (d, d):
            out = fused_sublayer_connection(
                x2d, self.alpha, self.bias, sublayer.w, sublayer.b,
                keep_scale=keep_scale)
            if out is None:
                # Weight too large to hold resident in VMEM -> tiled matmul with
                # the residual (+dropout) fused into the k==last epilogue.
                normed = pallas_layernorm(x2d, self.alpha, self.bias)
                out = pallas_linear(normed, sublayer.w, sublayer.b,
                                    residual=x2d, keep_scale=keep_scale)
            return out.reshape(b, s, d)

        # Generic path for arbitrary sublayers.
        normed = pallas_layernorm(x2d, self.alpha, self.bias)
        sub_out = sublayer(normed.reshape(b, s, d)).reshape(n, -1)
        if keep_scale is not None:
            out = pallas_residual_dropout(x2d, sub_out, keep_scale)
        else:
            out = pallas_residual_add(x2d, sub_out)
        return out.reshape(b, s, d)


# ----------------------------- main -----------------------------------------

if __name__ == "__main__":
    B, S, D = 2, 8, 32
    key = jax.random.PRNGKey(0)
    kx, kw, kb, kd = jax.random.split(key, 4)

    x = jax.random.normal(kx, (B, S, D), dtype=jnp.float32)
    w = jax.random.normal(kw, (D, D), dtype=jnp.float32) * 0.02
    bvec = jax.random.normal(kb, (D,), dtype=jnp.float32) * 0.02

    module = SublayerConnection(size=D, dropout=0.1)
    linear_sub = LinearSublayer(w, bvec)

    # Fused eval-mode path (single pallas_call).
    out_fused = jax.block_until_ready(module(x, linear_sub, training=False))

    # Generic (unfused) path: LN kernel -> tiled matmul -> residual add.
    def generic_sub(h):
        bb, s, d = h.shape
        return pallas_linear(h.reshape(bb * s, d), w, bvec).reshape(bb, s, d)

    out_generic = jax.block_until_ready(module(x, generic_sub, training=False))

    # Exercise the large-d fallback too: tiled matmul with the residual fused
    # into the k==last epilogue.
    x2d = x.reshape(B * S, D)
    normed2d = pallas_layernorm(x2d, module.alpha, module.bias)
    out_fallback = jax.block_until_ready(
        pallas_linear(normed2d, w, bvec, residual=x2d)).reshape(B, S, D)

    # Pure-JAX reference (torch semantics: unbiased std, eps added to std).
    mean = jnp.mean(x, axis=-1, keepdims=True)
    diff = x - mean
    std = jnp.sqrt(jnp.sum(diff * diff, axis=-1, keepdims=True) / (D - 1))
    normed_ref = module.alpha * diff / (std + EPS) + module.bias
    ref = x + (jnp.einsum("bsd,de->bse", normed_ref, w) + bvec)

    tol = dict(atol=2e-3, rtol=2e-3)   # bf16 MXU matmul tolerance
    assert out_fused.shape == (B, S, D)
    assert jnp.allclose(out_fused, ref, **tol), "fused mismatch"
    assert jnp.allclose(out_generic, ref, **tol), "generic mismatch"
    assert jnp.allclose(out_fallback, ref, **tol), "fallback mismatch"

    # Training / dropout path: every element must be either the plain residual
    # (dropped) or the rescaled sublayer output (kept).
    out_train = jax.block_until_ready(
        module(x, linear_sub, training=True, rng=kd))
    assert out_train.shape == (B, S, D)
    keep_prob = 1.0 - module.dropout_rate
    resid = out_train - x
    sub_ref = ref - x
    ok = (jnp.abs(resid) < 1e-5) | (jnp.abs(resid - sub_ref / keep_prob) < 3e-3)
    assert bool(jnp.all(ok)), "dropout path mismatch"

    print("KERNEL_OK")
</pallas_src>

<mosaic_0001>
module attributes {stable_mosaic.version = 11 : i64} {
  func.func @_fused_kernel(%arg0: i32, %arg1: memref<8x128xf32, #tpu.memory_space<vmem>>, %arg2: memref<1x128xf32, #tpu.memory_space<vmem>>, %arg3: memref<1x128xf32, #tpu.memory_space<vmem>>, %arg4: memref<128x128xbf16, #tpu.memory_space<vmem>>, %arg5: memref<1x128xf32, #tpu.memory_space<vmem>>, %arg6: memref<8x128xf32, #tpu.memory_space<vmem>>) attributes {dimension_semantics = [#tpu.dimension_semantics<parallel>], iteration_bounds = array<i64: 2>, scalar_prefetch = 0 : i64, scratch_operands = 0 : i64, tpu.core_type = #tpu.core_type<tc>, window_params = [{transform_indices = @transform_0, window_bounds = array<i64: 8, 128>}, {pipeline_mode = #tpu.pipeline_mode<synchronous>, transform_indices = @transform_1, window_bounds = array<i64: 1, 128>}, {pipeline_mode = #tpu.pipeline_mode<synchronous>, transform_indices = @transform_2, window_bounds = array<i64: 1, 128>}, {pipeline_mode = #tpu.pipeline_mode<synchronous>, transform_indices = @transform_3, window_bounds = array<i64: 128, 128>}, {pipeline_mode = #tpu.pipeline_mode<synchronous>, transform_indices = @transform_4, window_bounds = array<i64: 1, 128>}, {transform_indices = @transform_5, window_bounds = array<i64: 8, 128>}]} {
    %c0 = arith.constant 0 : index
    %c0_0 = arith.constant 0 : index
    %0 = vector.load %arg1[%c0, %c0_0] : memref<8x128xf32, #tpu.memory_space<vmem>>, vector<8x128xf32>
    %c0_1 = arith.constant 0 : index
    %c0_2 = arith.constant 0 : index
    %1 = vector.load %arg2[%c0_1, %c0_2] : memref<1x128xf32, #tpu.memory_space<vmem>>, vector<1x128xf32>
    %cst = arith.constant dense<0.000000e+00> : vector<8xf32>
    %2 = vector.multi_reduction <add>, %0, %cst [1] : vector<8x128xf32> to vector<8xf32>
    %3 = vector.shape_cast %2 : vector<8xf32> to vector<8x1xf32>
    %cst_3 = arith.constant 3.125000e-02 : f32
    %4 = vector.broadcast %cst_3 : f32 to vector<8x1xf32>
    %5 = arith.mulf %3, %4 : vector<8x1xf32>
    %6 = vector.broadcast %5 : vector<8x1xf32> to vector<8x128xf32>
    %7 = arith.subf %0, %6 : vector<8x128xf32>
    %8 = tpu.iota {dimensions = array<i32: 1>} : vector<8x128xi32>
    %c32_i32 = arith.constant 32 : i32
    %9 = vector.broadcast %c32_i32 : i32 to vector<8x128xi32>
    %10 = arith.cmpi slt, %8, %9 : vector<8x128xi32>
    %cst_4 = arith.constant 0.000000e+00 : f32
    %11 = vector.broadcast %cst_4 : f32 to vector<8x128xf32>
    %12 = arith.select %10, %7, %11 : vector<8x128xi1>, vector<8x128xf32>
    %13 = arith.mulf %12, %12 : vector<8x128xf32>
    %cst_5 = arith.constant dense<0.000000e+00> : vector<8xf32>
    %14 = vector.multi_reduction <add>, %13, %cst_5 [1] : vector<8x128xf32> to vector<8xf32>
    %15 = vector.shape_cast %14 : vector<8xf32> to vector<8x1xf32>
    %cst_6 = arith.constant 0.0322580636 : f32
    %16 = vector.broadcast %cst_6 : f32 to vector<8x1xf32>
    %17 = arith.mulf %15, %16 : vector<8x1xf32>
    %18 = math.sqrt %17 : vector<8x1xf32>
    %cst_7 = arith.constant 9.99999997E-7 : f32
    %19 = vector.broadcast %cst_7 : f32 to vector<8x1xf32>
    %20 = arith.addf %18, %19 : vector<8x1xf32>
    %cst_8 = arith.constant 1.000000e+00 : f32
    %21 = vector.broadcast %cst_8 : f32 to vector<8x1xf32>
    %22 = arith.divf %21, %20 : vector<8x1xf32>
    %23 = vector.broadcast %22 : vector<8x1xf32> to vector<8x128xf32>
    %24 = arith.mulf %12, %23 : vector<8x128xf32>
    %25 = vector.broadcast %1 : vector<1x128xf32> to vector<8x128xf32>
    %26 = arith.mulf %25, %24 : vector<8x128xf32>
    %c0_9 = arith.constant 0 : index
    %c0_10 = arith.constant 0 : index
    %27 = vector.load %arg3[%c0_9, %c0_10] : memref<1x128xf32, #tpu.memory_space<vmem>>, vector<1x128xf32>
    %28 = vector.broadcast %27 : vector<1x128xf32> to vector<8x128xf32>
    %29 = arith.addf %26, %28 : vector<8x128xf32>
    %30 = arith.truncf %29 : vector<8x128xf32> to vector<8x128xbf16>
    %c0_11 = arith.constant 0 : index
    %c0_12 = arith.constant 0 : index
    %31 = vector.load %arg4[%c0_11, %c0_12] : memref<128x128xbf16, #tpu.memory_space<vmem>>, vector<128x128xbf16>
    %cst_13 = arith.constant dense<0.000000e+00> : vector<8x128xf32>
    %32 = tpu.matmul %30, %31, %cst_13 {dimension_numbers = #tpu.dot_dimension_numbers<[1], [0], [0], [1], [0, 0, 1, 1], [], []>} : vector<8x128xbf16>, vector<128x128xbf16>, vector<8x128xf32> -> vector<8x128xf32>
    %c0_14 = arith.constant 0 : index
    %c0_15 = arith.constant 0 : index
    %33 = vector.load %arg5[%c0_14, %c0_15] : memref<1x128xf32, #tpu.memory_space<vmem>>, vector<1x128xf32>
    %34 = vector.broadcast %33 : vector<1x128xf32> to vector<8x128xf32>
    %35 = arith.addf %32, %34 : vector<8x128xf32>
    %36 = arith.addf %0, %35 : vector<8x128xf32>
    %c0_16 = arith.constant 0 : index
    %c0_17 = arith.constant 0 : index
    %37 = vector.load %arg6[%c0_16, %c0_17] : memref<8x128xf32, #tpu.memory_space<vmem>>, vector<8x128xf32>
    tpu.vector_store %arg6[%c0_16, %c0_17], %36 {strides = array<i32>} : memref<8x128xf32, #tpu.memory_space<vmem>>, vector<8x128xf32>,
    return
  }
  func.func @transform_0(%arg0: i32) -> (i32, i32) {
    %c0_i32 = arith.constant 0 : i32
    %c0_i32_0 = arith.constant 0 : i32
    return %arg0, %c0_i32 : i32, i32
  }
  func.func @transform_1(%arg0: i32) -> (i32, i32) {
    %c0_i32 = arith.constant 0 : i32
    %c0_i32_0 = arith.constant 0 : i32
    %c0_i32_1 = arith.constant 0 : i32
    return %c0_i32, %c0_i32_0 : i32, i32
  }
  func.func @transform_2(%arg0: i32) -> (i32, i32) {
    %c0_i32 = arith.constant 0 : i32
    %c0_i32_0 = arith.constant 0 : i32
    %c0_i32_1 = arith.constant 0 : i32
    return %c0_i32, %c0_i32_0 : i32, i32
  }
  func.func @transform_3(%arg0: i32) -> (i32, i32) {
    %c0_i32 = arith.constant 0 : i32
    %c0_i32_0 = arith.constant 0 : i32
    %c0_i32_1 = arith.constant 0 : i32
    return %c0_i32, %c0_i32_0 : i32, i32
  }
  func.func @transform_4(%arg0: i32) -> (i32, i32) {
    %c0_i32 = arith.constant 0 : i32
    %c0_i32_0 = arith.constant 0 : i32
    %c0_i32_1 = arith.constant 0 : i32
    return %c0_i32, %c0_i32_0 : i32, i32
  }
  func.func @transform_5(%arg0: i32) -> (i32, i32) {
    %c0_i32 = arith.constant 0 : i32
    %c0_i32_0 = arith.constant 0 : i32
    return %arg0, %c0_i32 : i32, i32
  }
}

</mosaic_0001>

<bundles_post_ra>
// kernel: tpu_custom_call.1
= control target key start
LH: loop header
LB: loop body
LE: loop exit
PB: predicated region body
PF: predicated region fallthrough
CT: control target
= control target key end

     0   :  { %10 = vsyncpa [#allocation3], 0  ;;  %s998_s0 = inlined_call_operand.hbm [shape: f32[16,128], index: 0, kind: input, shape index: {}]   ;;  %s999_s1 = inlined_call_operand.hbm [shape: f32[1,128], index: 1, kind: input, shape index: {}]   ;;  %s1000_s2 = inlined_call_operand.vmem [shape: f32[1,128], index: 2, kind: input, shape index: {}]   ;;  %s1001_s3 = inlined_call_operand.hbm [shape: bf16[128,128], index: 3, kind: input, shape index: {}]   ;;  %s1002_s4 = inlined_call_operand.vmem [shape: f32[1,128], index: 4, kind: input, shape index: {}]   ;;  %s1003_s5 = inlined_call_operand.hbm [shape: f32[16,128], index: 5, kind: output, shape index: {}]  }
   0x1   :  { %12 = vsyncpa [#allocation3 + $0x1], 0 }
   0x2   :  { %13 = vsyncpa [#allocation6], 0 }
   0x3   :  { %14 = vsyncpa [#allocation4], 0 }
   0x4   :  { %16 = vsyncpa [#allocation4 + $0x1], 0  ;;  %s842_s18 = smov 0   ;;  %s844_s19 = smov 0  }
   0x5   :  { %s846_s20 = smov 0   ;;  %s848_s21 = smov 0  }
   0x6 LB: > { %s863_s22 = sadd.s32 4294967295, %s806_s21   ;;  %s514_s23 = sadd.s32 4294967294, %s806_s21   ;;  %s806_s21 = sphi %s848_s21, %s1013_s21   ;;  %s802_s20 = sphi %s846_s20, %s1012_s20   ;;  %s798_s19 = sphi %s844_s19, %s1011_s19   ;;  %s794_s18 = sphi %s842_s18, %s1010_s18  }
   0x7   : > { %p42_p0 = scmp.ne.s32.totalorder %s798_s19, %s794_s18  ;;  %p43_p1 = scmp.eq.s32.totalorder %s863_s22, 0 }
   0x8   : > { %p150_p2 = scmp.eq.s32.totalorder %s863_s22, 1  ;;  %p156_p3 = scmp.eq.s32.totalorder %s514_s23, 1 }
   0x9   : > { %p872_p4 = por %p43_p1, %p42_p0  ;;  %p515_p5 = scmp.ge.s32.totalorder %s806_s21, 1 }
   0xa   : > { %p877_p6 = por %p156_p3, %p42_p0  ;;  %p163_p7 = scmp.lt.s32.totalorder %s806_s21, 3 }
   0xb   : > { %s175_s28 = sshll.u32 %s999_s1, 4  ;;  %s808_s30 = smov [#allocation5]   ;;  %s176_s28 = int_to_ptr.hbm [resolvable:$true] %s175_s28 }
   0xc   : > { %p885_p8 = pnand %p515_p5, %p163_p7  ;;  %s177_s6 = sshll.u32 %s808_s30, 4  ;;  %s178_s6 = int_to_ptr.vmem [resolvable:$true] %s177_s6 }
   0xd   : > { %s189_s9 = sshll.u32 %s1001_s3, 4  ;;  %s809_s10 = smov [#allocation7]   ;;  %s190_s9 = int_to_ptr.hbm [resolvable:$true] %s189_s9 }
   0xe   : > { %p582_p10 = pneg %p885_p8  ;;  %s191_s11 = sshll.u32 %s809_s10, 4  ;;  %s192_s11 = int_to_ptr.vmem [resolvable:$true] %s191_s11 }
   0xf   : > { %s810_s12 = smov 64   ;;  %s811_s13 = smov 4  }
  0x10   : > { %p583_p11 = pnand %p582_p10, %p43_p1  ;;  %s898_s14 = sadd.s32 1, %s806_s21  }
  0x11   : > { %s26_s15 = ssub.s32 %s806_s21, %s898_s14  ;;  %s29_s16 = sadd.s32 1, %s802_s20 }
  0x12   : > { %585 = dma.hbm_to_vmem [thread:$0]  (!%p583_p11), %s176_s28, 16, %s178_s6, [#allocation6]  }
  0x13   : > { %588 = dma.hbm_to_vmem [thread:$0]  (!%p583_p11), %s190_s9, 1024, %s192_s11, [#allocation6], %s810_s12, %s810_s12, %s811_s13  }
  0x14   : > { %p27_p12 = scmp.eq.s32.totalorder %s26_s15, 0  ;;  %p36_p13 = scmp.ne.s32.totalorder %s802_s20, %s798_s19 }
  0x15   : > { %p37_p0 = scmp.eq.s32.totalorder %s806_s21, 0  ;;  %p599_p7 = scmp.lt.s32.totalorder %s806_s21, 2 }
  0x16   : > { %s907_s17 = scalar_select %p27_p12, %s802_s20, %s29_s16  }
  0x17   : > { %p38_p3 = por %p37_p0, %p36_p13  ;;  %p911_p5 = por %p150_p2, %p36_p13 }
  0x18   : > { %s208_s26 = sand.u32 1, %s802_s20   ;;  %s520_s28 = sshll.u32 %s806_s21, 3 }
  0x19   : > { %s519_s27 = sshll.u32 %s208_s26, 3  ;;  %s216_s7 = scalar_lea.hbm %s998_s0, %s520_s28 }
  0x1a   : > { %s212_s8 = scalar_lea.vmem [#allocation2], %s519_s27  ;;  %s218_s10 = sshll.u32 %s216_s7, 4  ;;  %s219_s10 = int_to_ptr.hbm [resolvable:$true] %s218_s10 }
  0x1b   : > { %s220_s9 = sshll.u32 %s212_s8, 4  ;;  %p921_p10 = pnand %p599_p7, %p38_p3  ;;  %s221_s9 = int_to_ptr.vmem [resolvable:$true] %s220_s9 }
  0x1c   : > { %s209_s12 = scalar_lea.sflag [#allocation3], %s208_s26  ;;  %s706_s13 = sshra.s32 %s219_s10, 4  ;;  %s707_s13 = int_to_ptr.hbm [resolvable:$true] %s706_s13 }
  0x1d   : > { %s708_s15 = scalar_lea.hbm %s707_s13, 8  ;;  %p710_p11 = pneg %p921_p10 }
  0x1e   : > { %p709_p2 = scmp.ne.s32.totalorder %s707_s13, %s708_s15  ;;  %s713_s28 = scalar_lea.hbm %s998_s0, 16 }
  0x1f   : > { %p714_p0 = scmp.lt.s32.totalorder %s707_s13, %s998_s0  ;;  %p715_p3 = scmp.lt.s32.totalorder %s713_s28, %s708_s15 }
  0x20   : > { %p711_p12 = pnand %p710_p11, %p709_p2 }
  0x21   : > { %p716_p7 = por %p715_p3, %p714_p0 }
  0x22   : > { %p712_p13 = pneg %p711_p12 }
  0x24   : > { %p717_p9 = pnand %p716_p7, %p712_p13 }
  0x26   : > { %720 = shalt.err (!%p717_p9)
}
  0x27   : > { %592 = dma.hbm_to_vmem [thread:$0]  (!%p921_p10), %s219_s10, 128, %s221_s9, %s209_s12  }
  0x28   : > { %229 = sbr.rel (%p885_p8) target bundleno = 472 (0x1d8), region = 40  ;;  %s938_s26 = sand.u32 (!%p885_p8), 1, %s798_s19  }
  0x29   : > { %s522_s7 = sshll.u32 (!%p885_p8), %s938_s26, 3  ;;  %s232_s8 = scalar_lea.sflag (!%p885_p8), [#allocation3], %s938_s26 }
  0x2a   : > { %s235_s13 = scalar_lea.vmem (!%p885_p8), [#allocation2], %s522_s7 }
  0x2d   : > { %781 = dma.done.wait (%p872_p4), %s232_s8, 128  }
  0x2e   : > { %783 = vsyncadd (%p872_p4), %s232_s8, 4294967168 }
  0x2f   : > { %785 = dma.done.wait (%p43_p1), [#allocation6], 1040  }
  0x30   : > { %787 = vsyncadd (%p43_p1), [#allocation6], 4294966256  ;;  %v952_v0 = vld [vmem:[%s235_s13] sm:$0xff]  ;;  %v279_v1 = vlaneseq  ;;  %v566_v11 = vld [vmem:[#allocation7 + $0x20] sm:$0xff]  ;;  %s559_s9 = sshll.u32 %s863_s22, 3  ;;  %s272_s27 = scalar_lea.vmem [#allocation8], %s522_s7 }
  0x31   : > { %275 = vadd.xlane.f32.xlu0 %v952_v0  ;;  %v569_v8 = vld [vmem:[#allocation7 + $0x38] sm:$0xff]  ;;  %v568_v9 = vld [vmem:[#allocation7 + $0x30] sm:$0xff]  ;;  %v567_v10 = vld [vmem:[#allocation7 + $0x28] sm:$0xff]  ;;  %s420_s16 = scalar_lea.hbm %s1003_s5, %s559_s9  ;;  %s422_s28 = sshll.u32 %s272_s27, 4  ;;  %s423_s28 = int_to_ptr.vmem [resolvable:$true] %s422_s28 }
  0x32   : > { %v280_v2 = vand.u32 127, %v279_v1  ;;  %394 = vmatpush.bf16.msra.mxu0 %v569_v8  ;;  %v565_v13 = vld [vmem:[#allocation7 + $0x18] sm:$0xff]  ;;  %v564_v15 = vld [vmem:[#allocation7 + $0x10] sm:$0xff]  ;;  %v563_v16 = vld [vmem:[#allocation7 + $0x8] sm:$0xff]  ;;  %s424_s30 = sshll.u32 %s420_s16, 4  ;;  %s410_s22 = scalar_lea.sflag [#allocation4], %s938_s26  ;;  %s425_s30 = int_to_ptr.hbm [resolvable:$true] %s424_s30 }
  0x33   : > { %v562_v20 = vld [vmem:[#allocation7] sm:$0xff]  ;;  %v639_v38 = vld [vmem:[#allocation5] ss:$0 sm:$0xff]  ;;  %v640_v41 = vld [vmem:[%s1000_s2] ss:$0 sm:$0xff]  ;;  %s750_s6 = sshra.s32 %s425_s30, 4  ;;  %s751_s6 = int_to_ptr.hbm [resolvable:$true] %s750_s6 }
  0x34   : > { %vm281_vm0 = vcmp.lt.s32.totalorder %v280_v2, 32  ;;  %v641_v45 = vld [vmem:[%s1002_s4] ss:$0 sm:$0xff]  ;;  %s752_s8 = scalar_lea.hbm %s751_s6, 8  ;;  %s756_s7 = scalar_lea.hbm %s1003_s5, 16 }
  0x35   : > { %p753_p1 = scmp.ne.s32.totalorder %s751_s6, %s752_s8  ;;  %p757_p9 = scmp.lt.s32.totalorder %s751_s6, %s1003_s5 }
  0x36   : > { %395 = vmatpush.bf16.msra.mxu0 %v568_v9  ;;  %p758_p10 = scmp.lt.s32.totalorder %s756_s7, %s752_s8 }
  0x37   : > { %p754_p4 = pnand %p753_p1, %p911_p5 }
  0x38   : > { %p759_p2 = por %p758_p10, %p757_p9 }
  0x39   : > { %p755_p8 = pneg %p754_p4 }
  0x3a   : > { %396 = vmatpush.bf16.msra.mxu0 %v567_v10 }
  0x3b   : > { %p760_p11 = pnand %p759_p2, %p755_p8 }
  0x3e   : > { %397 = vmatpush.bf16.msra.mxu0 %v566_v11 }
  0x42   : > { %398 = vmatpush.bf16.msra.mxu0 %v565_v13 }
  0x46   : > { %399 = vmatpush.bf16.msra.mxu0 %v564_v15 }
  0x4a   : > { %400 = vmatpush.bf16.msra.mxu0 %v563_v16 }
  0x4e   : > { %401 = vmatpush.bf16.msra.mxu0 %v562_v20 }
  0xa4   : > { %v276_v3 = vpop.xlane.xlu0 %275 }
  0xa5   : > { %v277_v4 = vmul.f32 0.03125, %v276_v3 }
  0xa7   : > { %v278_v5 = vsub.f32 %v952_v0, %v277_v4 }
  0xa9   : > { %v282_v6 = vsel %vm281_vm0, %v278_v5, 0.0 }
  0xaa   : > { %v283_v7 = vmul.f32 %v282_v6, %v282_v6 }
  0xac   : > { %284 = vadd.xlane.f32.xlu0 %v283_v7 }
 0x11f   : > { %v285_v12 = vpop.xlane.xlu0 %284 }
 0x120   : > { %v286_v14 = vmul.f32 0.032258064, %v285_v12 }
 0x122   : > { %642 = vrsqrt.f32 %v286_v14  ;;  %vm294_vm1 = vcmp.eq.f32.partialorder %v286_v14, inf  ;;  %v297_v25 = vand.u32 2147483648, %v286_v14  ;;  %vm296_vm2 = vcmp.eq.f32.partialorder %v286_v14, 0.0 }
 0x128   : > { %v643_v17 = vpop.eup %642 }
 0x129   : > { %v288_v18 = vmul.f32 %v643_v17, %v286_v14 }
 0x12b   : > { %v289_v19 = vmul.f32 %v643_v17, %v288_v18 }
 0x12d   : > { %v290_v21 = vmul.f32 0.5, %v289_v19 }
 0x12f   : > { %v291_v22 = vsub.f32 1.5, %v290_v21 }
 0x131   : > { %v292_v23 = vmul.f32 %v643_v17, %v291_v22 }
 0x133   : > { %v293_v24 = vmul.f32 %v292_v23, %v286_v14 }
 0x135   : > { %v295_v26 = vsel %vm294_vm1, %v286_v14, %v293_v24 }
 0x136   : > { %v298_v27 = vsel %vm296_vm2, %v297_v25, %v295_v26 }
 0x137   : > { %v299_v28 = vadd.f32 1e-06, %v298_v27 }
 0x139   : > { %644 = vrcp.f32 %v299_v28  ;;  %v311_v32 = vand.u32 2147483648, %v299_v28  ;;  %v309_v34 = vand.u32 2147483647, %v299_v28  ;;  %vm305_vm4 = vweird.f32 %v299_v28 }
 0x13b   : > { %v312_v36 = vor.u32 1.1754944e-38, %v311_v32  ;;  %vm310_vm6 = vcmp.eq.f32.partialorder %v309_v34, 8.507059e+37 }
 0x13f   : > { %v645_v29 = vpop.eup %644 }
 0x140   : > { %v301_v30 = vmul.f32 %v645_v29, %v299_v28  ;;  %vm306_vm3 = vweird.f32 %v645_v29 }
 0x141   : > { %vm307_vm5 = vmor %vm305_vm4, %vm306_vm3 }
 0x142   : > { %v302_v31 = vsub.f32 1.0, %v301_v30 }
 0x144   : > { %v303_v33 = vmul.f32 %v645_v29, %v302_v31 }
 0x146   : > { %v304_v35 = vadd.f32 %v645_v29, %v303_v33 }
 0x148   : > { %v308_v37 = vsel %vm307_vm5, %v645_v29, %v304_v35 }
 0x149   : > { %v313_v39 = vsel %vm310_vm6, %v312_v36, %v308_v37 }
 0x14a   : > { %v315_v40 = vmul.f32 %v313_v39, %v282_v6 }
 0x14c   : > { %v319_v42 = vmul.f32 %v639_v38, %v315_v40 }
 0x14e   : > { %v324_v43 = vadd.f32 %v640_v41, %v319_v42 }
 0x150   : > { %v325_v44 = vpack.c.bf16 %v324_v43, %v324_v43 }
 0x152   : > { %402 = vmatmul.bf16.vlgmr.msra.gmra.mxu0 %v325_v44 }
 0x1cf   : > { %v403_v46 = vpop.f32.mrf.mxu0 }
 0x1d0   : > { %v404_v47 = vadd.f32 %v641_v45, %v403_v46 }
 0x1d2   : > { %v407_v48 = vadd.f32 %v404_v47, %v952_v0 }
 0x1d4   : > { %408 = vst [vmem:[%s272_s27] sm:$0xff] %v407_v48 }
 0x1d5   : > { %763 = shalt.err (!%p760_p11)
}
 0x1d6   : > { %580 = dma.vmem_to_hbm [thread:$0]  (%p911_p5), %s423_s28, 128, %s425_s30, %s410_s22  }
 0x1d7   : > { %v405_v49 = vpop.f32.mrf.mxu0 }
 0x1d8 PF: > { %s436_s26 = sand.u32 1, %s794_s18   ;;  %p1009_p12 = scmp.ge.s32.totalorder %s806_s21, 2 }
 0x1d9   : > { %s437_s10 = scalar_lea.sflag [#allocation4], %s436_s26 }
 0x1da   : > { %p594_p13 = pnand %p1009_p12, %p877_p6 }
 0x1dc   : > { %p595_p0 = pneg %p594_p13 }
 0x1de   : > { %789 = dma.done.wait (%p595_p0), %s437_s10, 128  }
 0x1df   : > { %791 = vsyncadd (%p595_p0), %s437_s10, 4294967168  ;;  %p19_p3 = scmp.ge.s32.totalorder %s898_s14, 4   ;;  %s1010_s18 = smov %s798_s19 }
 0x1e0   : > { %s1011_s19 = smov %s802_s20  ;;  %s1012_s20 = smov %s907_s17 }
 0x1e1   : > { %s1013_s21 = smov %s898_s14  ;;  %21 = sbr.rel (!%p19_p3) target bundleno = 6 (0x6), region = 93 }
 0x1e6   :  { %443 = vsyncpa [#allocation3], 1 }
 0x1e7   :  { %445 = vsyncpa [#allocation3 + $0x1], 1 }
 0x1e8   :  { %446 = vsyncpa [#allocation6], 1 }
 0x1e9   :  { %447 = vsyncpa [#allocation4], 1 }
 0x1ea   :  { %449 = vsyncpa [#allocation4 + $0x1], 1 }

</bundles_post_ra>
